<compile_context>
chip_gen: v6e
topology: v6e:2x2x1
jax: 0.10.0
libtpu: 0.0.40
codegen_flags: <defaults>
</compile_context>

<pallas_src>
import jax
import jax.numpy as jnp
from jax.experimental import pallas as pl
from jax.experimental.pallas import tpu as pltpu


def _critic_kernel(xu_ref, w1_ref, b1_ref, w2_ref, b2_ref, w3_ref, b3_ref,
                   out_ref):
    # l1: single fused dot over the concatenated (K-padded) input, bf16 MXU.
    xu = xu_ref[...].astype(jnp.bfloat16)                     # [TB, Kp]
    h1 = jnp.dot(xu, w1_ref[...], preferred_element_type=jnp.float32)
    h1 = jnp.maximum(h1 + b1_ref[...], 0.0)                   # [TB, 512] f32

    # l2: bf16 operands, f32 accumulation (native single-pass MXU).
    h2 = jnp.dot(h1.astype(jnp.bfloat16), w2_ref[...],
                 preferred_element_type=jnp.float32)
    h2 = jnp.maximum(h2 + b2_ref[...], 0.0)                   # [TB, 384] f32

    # l3 (N=1) as VPU multiply + lane (XLU) reduction in f32 — no thin MXU op.
    q = jnp.sum(h2 * w3_ref[...], axis=-1, keepdims=True)     # [TB, 1]
    q = q + b3_ref[0, 0]                                      # scalar from SMEM

    # Lane-dense store: broadcast q across 128 lanes (unmasked vst);
    # wrapper keeps column 0.
    out_ref[...] = jnp.broadcast_to(q, (q.shape[0], 128)).astype(out_ref.dtype)


def critic_forward(x, u, params, *, block_b=512):
    """x: [B, state_dim], u: [B, action_dim] -> q: [B, 1]."""
    w1, b1, w2, b2, w3row, b3 = params
    B = x.shape[0]
    Kp = w1.shape[0]           # padded input dim (multiple of 8)
    H1 = w1.shape[1]           # 512 (padded)
    H2 = w2.shape[1]           # 384 (padded)

    # Fused concat (+ zero-pad K) in the wrapper: one contiguous input operand.
    xu = jnp.concatenate([x, u], axis=1)
    k_in = xu.shape[1]

    # Batch tile: multiple of 8, capped at block_b, and sized so the grid has
    # >= 2 steps whenever B permits (lets v7x shard the batch over both TCs).
    block_b = max(8, (block_b // 8) * 8)
    b8 = ((B + 7) // 8) * 8
    half = ((pl.cdiv(b8, 2) + 7) // 8) * 8
    tb = max(8, min(block_b, half))
    b_pad = pl.cdiv(B, tb) * tb
    nb = b_pad // tb

    if b_pad != B or k_in != Kp:
        xu = jnp.pad(xu, ((0, b_pad - B), (0, Kp - k_in)))

    const = lambda shape: pl.BlockSpec(shape, lambda i: (0, 0))

    out = pl.pallas_call(
        _critic_kernel,
        out_shape=jax.ShapeDtypeStruct((b_pad, 128), jnp.float32),
        grid=(nb,),
        in_specs=[
            pl.BlockSpec((tb, Kp), lambda i: (i, 0)),   # xu tile
            const((Kp, H1)),                            # w1 (bf16, VMEM)
            const((1, H1)),                             # b1 (f32)
            const((H1, H2)),                            # w2 (bf16, VMEM)
            const((1, H2)),                             # b2 (f32)
            const((1, H2)),                             # w3 row (f32)
            pl.BlockSpec(memory_space=pltpu.MemorySpace.SMEM),  # b3 scalar
        ],
        out_specs=pl.BlockSpec((tb, 128), lambda i: (i, 0)),
        compiler_params=pltpu.CompilerParams(
            dimension_semantics=("parallel",),
            vmem_limit_bytes=32 << 20),
    )(xu, w1, b1, w2, b2, w3row, b3)

    return out[:B, :1]


def init_critic_params(key, state_dim, action_dim):
    """PyTorch nn.Linear default init: U(-1/sqrt(fan_in), 1/sqrt(fan_in)).

    Returns (kernel_params, ref_params):
      kernel_params: fused / zero-padded / bf16-weight layout for the kernel.
      ref_params:    unpadded f32 [in, out] layout for the pure-JAX reference.
    """
    H1, H2 = 400, 300
    H1P, H2P = 512, 384                       # padded to multiples of 128
    fan1 = state_dim + action_dim
    KP = ((fan1 + 7) // 8) * 8                # padded concat width

    kw1, kb1, kw2, kb2, kw3, kb3 = jax.random.split(key, 6)

    def uinit(k, shape, fan_in):
        bound = 1.0 / (fan_in ** 0.5)
        return jax.random.uniform(k, shape, jnp.float32,
                                  minval=-bound, maxval=bound)

    w1 = uinit(kw1, (fan1, H1), fan1)
    b1 = uinit(kb1, (1, H1), fan1)
    w2 = uinit(kw2, (H1, H2), H1)
    b2 = uinit(kb2, (1, H2), H1)
    w3 = uinit(kw3, (H2, 1), H2)
    b3 = uinit(kb3, (1, 1), H2)

    ref_params = (w1, b1, w2, b2, w3, b3)

    # Kernel layout: zero-pad (padded rows/lanes contribute exactly zero
    # through relu / the final reduction), weights cast to bf16 for the MXU.
    kernel_params = (
        jnp.pad(w1, ((0, KP - fan1), (0, H1P - H1))).astype(jnp.bfloat16),
        jnp.pad(b1, ((0, 0), (0, H1P - H1))),               # b1  [1, 512] f32
        jnp.pad(w2, ((0, H1P - H1), (0, H2P - H2))).astype(jnp.bfloat16),
        jnp.pad(b2, ((0, 0), (0, H2P - H2))),               # b2  [1, 384] f32
        jnp.pad(w3.T, ((0, 0), (0, H2P - H2))),             # w3  [1, 384] f32
        b3,                                                 # b3  [1, 1] (SMEM)
    )
    return kernel_params, ref_params


def critic_ref(x, u, params):
    """Pure-JAX f32 reference matching the PyTorch module."""
    w1, b1, w2, b2, w3, b3 = params
    h = jnp.concatenate([x, u], axis=1)
    h = jnp.maximum(h @ w1 + b1, 0.0)
    h = jnp.maximum(h @ w2 + b2, 0.0)
    return h @ w3 + b3


if __name__ == "__main__":
    # Small shapes consistent with a continuous-control env (e.g. Pendulum-v1).
    batch, state_dim, action_dim = 2, 3, 1

    key = jax.random.PRNGKey(0)
    key, kx, ku, kp = jax.random.split(key, 4)
    x = jax.random.normal(kx, (batch, state_dim), jnp.float32)
    u = jax.random.uniform(ku, (batch, action_dim), jnp.float32,
                           minval=-1.0, maxval=1.0)
    kernel_params, ref_params = init_critic_params(kp, state_dim, action_dim)

    q = critic_forward(x, u, kernel_params)
    jax.block_until_ready(q)

    q_ref = critic_ref(x, u, ref_params)
    assert q.shape == (batch, 1)
    # bf16 MXU operands vs. the f32 reference: ~1e-2 relative agreement.
    assert jnp.allclose(q, q_ref, atol=3e-2, rtol=3e-2), (q, q_ref)

    print("KERNEL_OK")
</pallas_src>

<mosaic_0001>
module attributes {stable_mosaic.version = 11 : i64} {
  func.func @_critic_kernel(%arg0: i32, %arg1: memref<8x8xf32, #tpu.memory_space<vmem>>, %arg2: memref<8x512xbf16, #tpu.memory_space<vmem>>, %arg3: memref<1x512xf32, #tpu.memory_space<vmem>>, %arg4: memref<512x384xbf16, #tpu.memory_space<vmem>>, %arg5: memref<1x384xf32, #tpu.memory_space<vmem>>, %arg6: memref<1x384xf32, #tpu.memory_space<vmem>>, %arg7: memref<1x1xf32, #tpu.memory_space<smem>>, %arg8: memref<8x128xf32, #tpu.memory_space<vmem>>) attributes {dimension_semantics = [#tpu.dimension_semantics<parallel>], iteration_bounds = array<i64: 1>, scalar_prefetch = 0 : i64, scratch_operands = 0 : i64, tpu.core_type = #tpu.core_type<tc>, window_params = [{transform_indices = @transform_0, window_bounds = array<i64: 8, 8>}, {pipeline_mode = #tpu.pipeline_mode<synchronous>, transform_indices = @transform_1, window_bounds = array<i64: 8, 512>}, {pipeline_mode = #tpu.pipeline_mode<synchronous>, transform_indices = @transform_2, window_bounds = array<i64: 1, 512>}, {pipeline_mode = #tpu.pipeline_mode<synchronous>, transform_indices = @transform_3, window_bounds = array<i64: 512, 384>}, {pipeline_mode = #tpu.pipeline_mode<synchronous>, transform_indices = @transform_4, window_bounds = array<i64: 1, 384>}, {pipeline_mode = #tpu.pipeline_mode<synchronous>, transform_indices = @transform_5, window_bounds = array<i64: 1, 384>}, {transform_indices = @transform_6, window_bounds = array<i64: 1, 1>}, {transform_indices = @transform_7, window_bounds = array<i64: 8, 128>}]} {
    %c0 = arith.constant 0 : index
    %c0_0 = arith.constant 0 : index
    %0 = vector.load %arg1[%c0, %c0_0] : memref<8x8xf32, #tpu.memory_space<vmem>>, vector<8x8xf32>
    %1 = arith.truncf %0 : vector<8x8xf32> to vector<8x8xbf16>
    %c0_1 = arith.constant 0 : index
    %c0_2 = arith.constant 0 : index
    %2 = vector.load %arg2[%c0_1, %c0_2] : memref<8x512xbf16, #tpu.memory_space<vmem>>, vector<8x512xbf16>
    %cst = arith.constant dense<0.000000e+00> : vector<8x512xf32>
    %3 = tpu.matmul %1, %2, %cst {dimension_numbers = #tpu.dot_dimension_numbers<[1], [0], [0], [1], [0, 0, 1, 1], [], []>} : vector<8x8xbf16>, vector<8x512xbf16>, vector<8x512xf32> -> vector<8x512xf32>
    %c0_3 = arith.constant 0 : index
    %c0_4 = arith.constant 0 : index
    %4 = vector.load %arg3[%c0_3, %c0_4] : memref<1x512xf32, #tpu.memory_space<vmem>>, vector<1x512xf32>
    %5 = vector.broadcast %4 : vector<1x512xf32> to vector<8x512xf32>
    %6 = arith.addf %3, %5 : vector<8x512xf32>
    %cst_5 = arith.constant 0.000000e+00 : f32
    %7 = vector.broadcast %cst_5 : f32 to vector<8x512xf32>
    %8 = arith.maximumf %6, %7 : vector<8x512xf32>
    %9 = arith.truncf %8 : vector<8x512xf32> to vector<8x512xbf16>
    %c0_6 = arith.constant 0 : index
    %c0_7 = arith.constant 0 : index
    %10 = vector.load %arg4[%c0_6, %c0_7] : memref<512x384xbf16, #tpu.memory_space<vmem>>, vector<512x384xbf16>
    %cst_8 = arith.constant dense<0.000000e+00> : vector<8x384xf32>
    %11 = tpu.matmul %9, %10, %cst_8 {dimension_numbers = #tpu.dot_dimension_numbers<[1], [0], [0], [1], [0, 0, 1, 1], [], []>} : vector<8x512xbf16>, vector<512x384xbf16>, vector<8x384xf32> -> vector<8x384xf32>
    %c0_9 = arith.constant 0 : index
    %c0_10 = arith.constant 0 : index
    %12 = vector.load %arg5[%c0_9, %c0_10] : memref<1x384xf32, #tpu.memory_space<vmem>>, vector<1x384xf32>
    %13 = vector.broadcast %12 : vector<1x384xf32> to vector<8x384xf32>
    %14 = arith.addf %11, %13 : vector<8x384xf32>
    %cst_11 = arith.constant 0.000000e+00 : f32
    %15 = vector.broadcast %cst_11 : f32 to vector<8x384xf32>
    %16 = arith.maximumf %14, %15 : vector<8x384xf32>
    %c0_12 = arith.constant 0 : index
    %c0_13 = arith.constant 0 : index
    %17 = vector.load %arg6[%c0_12, %c0_13] : memref<1x384xf32, #tpu.memory_space<vmem>>, vector<1x384xf32>
    %18 = vector.broadcast %17 : vector<1x384xf32> to vector<8x384xf32>
    %19 = arith.mulf %16, %18 : vector<8x384xf32>
    %cst_14 = arith.constant dense<0.000000e+00> : vector<8xf32>
    %20 = vector.multi_reduction <add>, %19, %cst_14 [1] : vector<8x384xf32> to vector<8xf32>
    %21 = vector.shape_cast %20 : vector<8xf32> to vector<8x1xf32>
    %c0_15 = arith.constant 0 : index
    %c0_16 = arith.constant 0 : index
    %22 = memref.load %arg7[%c0_15, %c0_16] : memref<1x1xf32, #tpu.memory_space<smem>>
    %23 = vector.broadcast %22 : f32 to vector<8x1xf32>
    %24 = arith.addf %21, %23 : vector<8x1xf32>
    %25 = vector.shape_cast %24 : vector<8x1xf32> to vector<8x1xf32>
    %26 = vector.broadcast %25 : vector<8x1xf32> to vector<8x128xf32>
    %c0_17 = arith.constant 0 : index
    %c0_18 = arith.constant 0 : index
    %27 = vector.load %arg8[%c0_17, %c0_18] : memref<8x128xf32, #tpu.memory_space<vmem>>, vector<8x128xf32>
    tpu.vector_store %arg8[%c0_17, %c0_18], %26 {strides = array<i32>} : memref<8x128xf32, #tpu.memory_space<vmem>>, vector<8x128xf32>,
    return
  }
  func.func @transform_0(%arg0: i32) -> (i32, i32) {
    %c0_i32 = arith.constant 0 : i32
    %c0_i32_0 = arith.constant 0 : i32
    return %arg0, %c0_i32 : i32, i32
  }
  func.func @transform_1(%arg0: i32) -> (i32, i32) {
    %c0_i32 = arith.constant 0 : i32
    %c0_i32_0 = arith.constant 0 : i32
    %c0_i32_1 = arith.constant 0 : i32
    return %c0_i32, %c0_i32_0 : i32, i32
  }
  func.func @transform_2(%arg0: i32) -> (i32, i32) {
    %c0_i32 = arith.constant 0 : i32
    %c0_i32_0 = arith.constant 0 : i32
    %c0_i32_1 = arith.constant 0 : i32
    return %c0_i32, %c0_i32_0 : i32, i32
  }
  func.func @transform_3(%arg0: i32) -> (i32, i32) {
    %c0_i32 = arith.constant 0 : i32
    %c0_i32_0 = arith.constant 0 : i32
    %c0_i32_1 = arith.constant 0 : i32
    return %c0_i32, %c0_i32_0 : i32, i32
  }
  func.func @transform_4(%arg0: i32) -> (i32, i32) {
    %c0_i32 = arith.constant 0 : i32
    %c0_i32_0 = arith.constant 0 : i32
    %c0_i32_1 = arith.constant 0 : i32
    return %c0_i32, %c0_i32_0 : i32, i32
  }
  func.func @transform_5(%arg0: i32) -> (i32, i32) {
    %c0_i32 = arith.constant 0 : i32
    %c0_i32_0 = arith.constant 0 : i32
    %c0_i32_1 = arith.constant 0 : i32
    return %c0_i32, %c0_i32_0 : i32, i32
  }
  func.func @transform_6(%arg0: i32) -> (i32, i32) {
    %c0_i32 = arith.constant 0 : i32
    %c0_i32_0 = arith.constant 0 : i32
    %c0_i32_1 = arith.constant 0 : i32
    return %c0_i32, %c0_i32_0 : i32, i32
  }
  func.func @transform_7(%arg0: i32) -> (i32, i32) {
    %c0_i32 = arith.constant 0 : i32
    %c0_i32_0 = arith.constant 0 : i32
    return %arg0, %c0_i32 : i32, i32
  }
}

</mosaic_0001>

<bundles_post_ra>
// kernel: tpu_custom_call.1
= control target key start
LH: loop header
LB: loop body
LE: loop exit
PB: predicated region body
PF: predicated region fallthrough
CT: control target
= control target key end

     0   :  { %13 = vsyncpa [#allocation4], 0  ;;  %s1542_s0 = inlined_call_operand.hbm [shape: f32[8,8], index: 0, kind: input, shape index: {}]   ;;  %s1543_s1 = inlined_call_operand.hbm [shape: bf16[8,512], index: 1, kind: input, shape index: {}]   ;;  %s1544_s2 = inlined_call_operand.vmem [shape: f32[1,512], index: 2, kind: input, shape index: {}]   ;;  %s1545_s3 = inlined_call_operand.hbm [shape: bf16[512,384], index: 3, kind: input, shape index: {}]   ;;  %s1546_s4 = inlined_call_operand.vmem [shape: f32[1,384], index: 4, kind: input, shape index: {}]   ;;  %s1547_s5 = inlined_call_operand.vmem [shape: f32[1,384], index: 5, kind: input, shape index: {}]   ;;  %s1548_s6 = inlined_call_operand.<no memory space> [shape: f32[1,1], index: 6, kind: input, shape index: {}]   ;;  %s1549_s7 = inlined_call_operand.hbm [shape: f32[8,128], index: 7, kind: output, shape index: {}]  }
   0x1   :  { %14 = vsyncpa [#allocation7], 0 }
   0x2   :  { %15 = vsyncpa [#allocation5], 0  ;;  %s1448_s24 = smov [#allocation6]   ;;  %s1449_s26 = smov [#allocation3]  }
   0x3   :  { %s32_s25 = sshll.u32 %s1448_s24, 4  ;;  %s22_s27 = sshll.u32 %s1449_s26, 4  ;;  %s33_s25 = int_to_ptr.vmem [resolvable:$true] %s32_s25  ;;  %s23_s27 = int_to_ptr.vmem [resolvable:$true] %s22_s27 }
   0x4   :  { %s1370_s28 = scalar_lea.vmem %s33_s25, 256  ;;  %p1375_p1 = scmp.lt.s32.totalorder %s33_s25, %s33_s25 }
   0x5   :  { %p1371_p0 = scmp.ne.s32.totalorder %s33_s25, %s1370_s28  ;;  %p1376_p2 = scmp.lt.s32.totalorder %s1370_s28, %s1370_s28 }
   0x7   :  { %p1377_p3 = por %p1376_p2, %p1375_p1 }
   0x9   :  { %p1378_p4 = pnand %p1377_p3, %p1371_p0 }
   0xb   :  { %1381 = shalt.err (!%p1378_p4)
}
   0xc   :  { %35 = dma.hbm_to_vmem [thread:$0]  %s1543_s1, 256, %s33_s25, [#allocation7]  }
   0xd   :  { %s1390_s8 = scalar_lea.vmem %s23_s27, 128  ;;  %p1395_p6 = scmp.lt.s32.totalorder %s23_s27, %s23_s27 }
   0xe   :  { %p1391_p5 = scmp.ne.s32.totalorder %s23_s27, %s1390_s8  ;;  %p1396_p7 = scmp.lt.s32.totalorder %s1390_s8, %s1390_s8 }
  0x10   :  { %p1397_p8 = por %p1396_p7, %p1395_p6 }
  0x12   :  { %p1398_p9 = pnand %p1397_p8, %p1391_p5 }
  0x14   :  { %1401 = shalt.err (!%p1398_p9)
}
  0x15   :  { %25 = dma.hbm_to_vmem [thread:$0]  %s1542_s0, 128, %s23_s27, [#allocation4]  }
  0x16   :  { %s1450_s11 = smov [#allocation8]  }
  0x17   :  { %s43_s12 = sshll.u32 %s1450_s11, 4  ;;  %s44_s12 = int_to_ptr.vmem [resolvable:$true] %s43_s12 }
  0x18   :  { %s1410_s13 = scalar_lea.vmem %s44_s12, 12288  ;;  %p1415_p11 = scmp.lt.s32.totalorder %s44_s12, %s44_s12 }
  0x19   :  { %p1411_p10 = scmp.ne.s32.totalorder %s44_s12, %s1410_s13  ;;  %p1416_p12 = scmp.lt.s32.totalorder %s1410_s13, %s1410_s13 }
  0x1b   :  { %p1417_p13 = por %p1416_p12, %p1415_p11 }
  0x1d   :  { %p1418_p0 = pnand %p1417_p13, %p1411_p10 }
  0x1f   :  { %1421 = shalt.err (!%p1418_p0)
}
  0x20   :  { %s1451_s1 = smov 192   ;;  %s1452_s14 = smov 12  }
  0x21   :  { %49 = dma.hbm_to_vmem [thread:$0]  %s1545_s3, 12288, %s44_s12, [#allocation7], %s1451_s1, %s1451_s1, %s1452_s14  }
  0x22   :  { %1442 = dma.done.wait [#allocation4], 128  }
  0x23   :  { %1443 = vsyncadd [#allocation4], 4294967168 }
  0x24   :  { %1444 = dma.done.wait [#allocation7], 12544  }
  0x25   :  { %1445 = vsyncadd [#allocation7], 4294954752  ;;  %v1453_v0 = vmov 0   ;;  %v68_v1 = vld [vmem:[#allocation6] sm:$0xff]  ;;  %vm106_vm0 = vcmask 1043456   ;;  %v69_v2 = vld [vmem:[#allocation6 + $0x8] sm:$0xff] }
  0x26   :  { %151 = vmatprep.mubr.bf16.mxu0 %v1453_v0  ;;  %192 = vmatprep.mubr.bf16.mxu1 %v1453_v0  ;;  %v66_v3 = vld [vmem:[#allocation3] sm:$0xff]  ;;  %v1076_v4 = vcombine.high %v68_v1, %v68_v1  ;;  %v1078_v5 = vcombine.high %v69_v2, %v69_v2  ;;  %v1075_v6 = vcombine.low %v68_v1, %v68_v1  ;;  %vm102_vm1 = vcmask 64512   ;;  %v1242_v15 = vld [vmem:[#allocation8 + $0x94] ss:$12 sps:$4 sm:$0xff]   ;;  %v1240_v17 = vld [vmem:[#allocation8 + $0x90] ss:$12 sps:$4 sm:$0xff]  }
  0x27   :  { %v1077_v7 = vcombine.low %v69_v2, %v69_v2  ;;  %v1236_v8 = vld [vmem:[#allocation8 + $0xac] ss:$12 sps:$4 sm:$0xff]   ;;  %v67_v11 = vpack.c.bf16 %v66_v3, %v66_v3  ;;  %v1234_v12 = vld [vmem:[#allocation8 + $0xa8] ss:$12 sps:$4 sm:$0xff]   ;;  %v1243_v18 = vld [vmem:[#allocation8 + $0x210] ss:$12 sps:$4 sm:$0xff]  }
  0x28   :  { %1079 = vmatprep.subr.msk.bf16.mxu0 %vm106_vm0, %v1076_v4  ;;  %1081 = vmatprep.subr.msk.bf16.mxu1 %vm106_vm0, %v1078_v5  ;;  %v108_v9 = vsel %vm106_vm0, %v1075_v6, 0  ;;  %v1239_v13 = vld [vmem:[#allocation8 + $0x22c] ss:$12 sps:$4 sm:$0xff]   ;;  %v1237_v14 = vld [vmem:[#allocation8 + $0x228] ss:$12 sps:$4 sm:$0xff]   ;;  %s1454_s20 = smov [#allocation9]  }
  0x29   :  { %v114_v10 = vsel %vm106_vm0, %v1077_v7, 0  ;;  %134 = vmatpush1.bf16.msra.mxu0 %v108_v9  ;;  %v1245_v16 = vld [vmem:[#allocation8 + $0x214] ss:$12 sps:$4 sm:$0xff]   ;;  %v1248_v19 = vld [vmem:[#allocation8 + $0x7c] ss:$12 sps:$4 sm:$0xff]   ;;  %s1065_s21 = sshll.u32 %s1454_s20, 4  ;;  %s1066_s21 = int_to_ptr.vmem [resolvable:$true] %s1065_s21 }
  0x2a   :  { %175 = vmatpush1.bf16.msra.mxu1 %v114_v10  ;;  %866 = vmatprep.subr.bf16.mxu0 %v1236_v8  ;;  %v1251_v20 = vld [vmem:[#allocation8 + $0x1fc] ss:$12 sps:$4 sm:$0xff]   ;;  %v1246_v21 = vld [vmem:[#allocation8 + $0x78] ss:$12 sps:$4 sm:$0xff]   ;;  %v1252_v25 = vld [vmem:[#allocation8 + $0x60] ss:$12 sps:$4 sm:$0xff]   ;;  %p1427_p2 = scmp.lt.s32.totalorder %s1066_s21, %s1066_s21 }
  0x2b   :  { %907 = vmatprep.subr.bf16.mxu1 %v1239_v13  ;;  %v1249_v22 = vld [vmem:[#allocation8 + $0x1f8] ss:$12 sps:$4 sm:$0xff]   ;;  %v1255_v26 = vld [vmem:[#allocation8 + $0x1e0] ss:$12 sps:$4 sm:$0xff]   ;;  %v1258_v29 = vld [vmem:[#allocation8 + $0x48] ss:$12 sps:$4 sm:$0xff]   ;;  %v72_v13 = vlaneseq }
  0x2c   :  { %1080 = vmatmul.mubr.msk.bf16.vlgmr.msra.gmra.mxu0 %vm102_vm1, %v67_v11  ;;  %v1254_v23 = vld [vmem:[#allocation8 + $0x64] ss:$12 sps:$4 sm:$0xff]   ;;  %v1260_v27 = vld [vmem:[#allocation8 + $0x4c] ss:$12 sps:$4 sm:$0xff]   ;;  %v1261_v30 = vld [vmem:[#allocation8 + $0x1c8] ss:$12 sps:$4 sm:$0xff]  }
  0x2d   :  { %1082 = vmatmul.mubr.msk.bf16.vlgmr.msra.gmra.mxu1 %vm102_vm1, %v67_v11  ;;  %867 = vmatpush1.bf16.msra.mxu0 %v1234_v12  ;;  %v1257_v24 = vld [vmem:[#allocation8 + $0x1e4] ss:$12 sps:$4 sm:$0xff]   ;;  %v1263_v28 = vld [vmem:[#allocation8 + $0x1cc] ss:$12 sps:$4 sm:$0xff]   ;;  %v1266_v31 = vld [vmem:[#allocation8 + $0x34] ss:$12 sps:$4 sm:$0xff]  }
  0x2e   :  { %908 = vmatpush1.bf16.msra.mxu1 %v1237_v14  ;;  %868 = vmatprep.subr.bf16.mxu0 %v1242_v15  ;;  %v1269_v32 = vld [vmem:[#allocation8 + $0x1b4] ss:$12 sps:$4 sm:$0xff]   ;;  %v1264_v33 = vld [vmem:[#allocation8 + $0x30] ss:$12 sps:$4 sm:$0xff]   ;;  %v1270_v37 = vld [vmem:[#allocation8 + $0x18] ss:$12 sps:$4 sm:$0xff]  }
  0x2f   :  { %909 = vmatprep.subr.bf16.mxu1 %v1245_v16  ;;  %v1267_v34 = vld [vmem:[#allocation8 + $0x1b0] ss:$12 sps:$4 sm:$0xff]   ;;  %v1273_v38 = vld [vmem:[#allocation8 + $0x198] ss:$12 sps:$4 sm:$0xff]   ;;  %v1276_v41 = vld [vmem:[#allocation8] ss:$12 sps:$4 sm:$0xff]  }
  0x30   :  { %v1272_v35 = vld [vmem:[#allocation8 + $0x1c] ss:$12 sps:$4 sm:$0xff]   ;;  %v1278_v39 = vld [vmem:[#allocation8 + $0x4] ss:$12 sps:$4 sm:$0xff]   ;;  %v1279_v42 = vld [vmem:[#allocation8 + $0x180] ss:$12 sps:$4 sm:$0xff]  }
  0x31   :  { %869 = vmatpush1.bf16.msra.mxu0 %v1240_v17  ;;  %v1275_v36 = vld [vmem:[#allocation8 + $0x19c] ss:$12 sps:$4 sm:$0xff]   ;;  %v1281_v40 = vld [vmem:[#allocation8 + $0x184] ss:$12 sps:$4 sm:$0xff]   ;;  %v1284_v43 = vld [vmem:[#allocation8 + $0x16c] ss:$12 sps:$4 sm:$0xff]  }
  0x32   :  { %910 = vmatpush1.bf16.msra.mxu1 %v1243_v18  ;;  %870 = vmatprep.subr.bf16.mxu0 %v1248_v19  ;;  %v1287_v44 = vld [vmem:[#allocation8 + $0x2ec] ss:$12 sps:$4 sm:$0xff]   ;;  %v1282_v45 = vld [vmem:[#allocation8 + $0x168] ss:$12 sps:$4 sm:$0xff]   ;;  %v1288_v49 = vld [vmem:[#allocation8 + $0x150] ss:$12 sps:$4 sm:$0xff]  }
  0x33   :  { %911 = vmatprep.subr.bf16.mxu1 %v1251_v20  ;;  %v1285_v46 = vld [vmem:[#allocation8 + $0x2e8] ss:$12 sps:$4 sm:$0xff]   ;;  %v1291_v50 = vld [vmem:[#allocation8 + $0x2d0] ss:$12 sps:$4 sm:$0xff]   ;;  %v1294_v53 = vld [vmem:[#allocation8 + $0x138] ss:$12 sps:$4 sm:$0xff]  }
  0x34   :  { %v1290_v47 = vld [vmem:[#allocation8 + $0x154] ss:$12 sps:$4 sm:$0xff]   ;;  %v1296_v51 = vld [vmem:[#allocation8 + $0x13c] ss:$12 sps:$4 sm:$0xff]   ;;  %v1297_v54 = vld [vmem:[#allocation8 + $0x2b8] ss:$12 sps:$4 sm:$0xff]  }
  0x35   :  { %871 = vmatpush1.bf16.msra.mxu0 %v1246_v21  ;;  %v1293_v48 = vld [vmem:[#allocation8 + $0x2d4] ss:$12 sps:$4 sm:$0xff]   ;;  %v1299_v52 = vld [vmem:[#allocation8 + $0x2bc] ss:$12 sps:$4 sm:$0xff]   ;;  %v1302_v55 = vld [vmem:[#allocation8 + $0x124] ss:$12 sps:$4 sm:$0xff]  }
  0x36   :  { %912 = vmatpush1.bf16.msra.mxu1 %v1249_v22  ;;  %872 = vmatprep.subr.bf16.mxu0 %v1254_v23  ;;  %v1305_v56 = vld [vmem:[#allocation8 + $0x2a4] ss:$12 sps:$4 sm:$0xff]   ;;  %v1300_v57 = vld [vmem:[#allocation8 + $0x120] ss:$12 sps:$4 sm:$0xff]   ;;  %v1306_v61 = vld [vmem:[#allocation8 + $0x108] ss:$12 sps:$4 sm:$0xff]  }
  0x37   :  { %913 = vmatprep.subr.bf16.mxu1 %v1257_v24  ;;  %v1303_v58 = vld [vmem:[#allocation8 + $0x2a0] ss:$12 sps:$4 sm:$0xff]   ;;  %v1309_v62 = vld [vmem:[#allocation8 + $0x288] ss:$12 sps:$4 sm:$0xff]   ;;  %v1312_v1 = vld [vmem:[#allocation8 + $0xf0] ss:$12 sps:$4 sm:$0xff]  }
  0x38   :  { %v1308_v59 = vld [vmem:[#allocation8 + $0x10c] ss:$12 sps:$4 sm:$0xff]   ;;  %v1314_v63 = vld [vmem:[#allocation8 + $0xf4] ss:$12 sps:$4 sm:$0xff]   ;;  %v1315_v2 = vld [vmem:[#allocation8 + $0x270] ss:$12 sps:$4 sm:$0xff]  }
  0x39   :  { %873 = vmatpush1.bf16.msra.mxu0 %v1252_v25  ;;  %v1311_v60 = vld [vmem:[#allocation8 + $0x28c] ss:$12 sps:$4 sm:$0xff]   ;;  %v1317_v0 = vld [vmem:[#allocation8 + $0x274] ss:$12 sps:$4 sm:$0xff]   ;;  %v1320_v3 = vld [vmem:[#allocation8 + $0xdc] ss:$12 sps:$4 sm:$0xff]  }
  0x3a   :  { %914 = vmatpush1.bf16.msra.mxu1 %v1255_v26  ;;  %874 = vmatprep.subr.bf16.mxu0 %v1260_v27  ;;  %v1323_v4 = vld [vmem:[#allocation8 + $0x25c] ss:$12 sps:$4 sm:$0xff]   ;;  %v1318_v5 = vld [vmem:[#allocation8 + $0xd8] ss:$12 sps:$4 sm:$0xff]   ;;  %v1324_v9 = vld [vmem:[#allocation8 + $0xc0] ss:$12 sps:$4 sm:$0xff]  }
  0x3b   :  { %915 = vmatprep.subr.bf16.mxu1 %v1263_v28  ;;  %v1321_v6 = vld [vmem:[#allocation8 + $0x258] ss:$12 sps:$4 sm:$0xff]   ;;  %v1327_v10 = vld [vmem:[#allocation8 + $0x240] ss:$12 sps:$4 sm:$0xff]   ;;  %v1330_v11 = vld [vmem:[#allocation8 + $0x170] ss:$12 sps:$4 sm:$0xff]  }
  0x3c   :  { %v1326_v7 = vld [vmem:[#allocation8 + $0xc4] ss:$12 sps:$4 sm:$0xff]   ;;  %v73_v14 = vshrl.u32 %v72_v13, 7  ;;  %v70_v17 = vld [vmem:[%s1544_s2] sm:$0xf]  ;;  %s1422_s22 = scalar_lea.vmem %s1066_s21, 128 }
  0x3d   :  { %875 = vmatpush1.bf16.msra.mxu0 %v1258_v29  ;;  %v1329_v8 = vld [vmem:[#allocation8 + $0x244] ss:$12 sps:$4 sm:$0xff]   ;;  %p1423_p1 = scmp.ne.s32.totalorder %s1066_s21, %s1422_s22  ;;  %p1428_p3 = scmp.lt.s32.totalorder %s1422_s22, %s1422_s22 }
  0x3e   :  { %916 = vmatpush1.bf16.msra.mxu1 %v1261_v30  ;;  %876 = vmatprep.subr.bf16.mxu0 %v1266_v31  ;;  %v1331_v12 = vld [vmem:[#allocation8 + $0x2f0] ss:$12 sps:$4 sm:$0xff]   ;;  %v1504_v15 = vsub.s32 0, %v73_v14  ;;  %v1506_v16 = vsub.s32 2, %v73_v14  ;;  %v1511_v18 = vsub.s32 1, %v73_v14  ;;  %v86_v19 = vsub.s32 3, %v73_v14 }
  0x3f   :  { %917 = vmatprep.subr.bf16.mxu1 %v1269_v32  ;;  %p1429_p4 = por %p1428_p3, %p1427_p2 }
  0x40   :  { %v75_v20 = vrot.slane %v70_v17, %v1504_v15  ;;  %v83_v21 = vrot.slane %v70_v17, %v1506_v16  ;;  %v79_v22 = vrot.slane %v70_v17, %v1511_v18  ;;  %v87_v23 = vrot.slane %v70_v17, %v86_v19 }
  0x41   :  { %877 = vmatpush1.bf16.msra.mxu0 %v1264_v33  ;;  %p1430_p5 = pnand %p1429_p4, %p1423_p1 }
  0x42   :  { %918 = vmatpush1.bf16.msra.mxu1 %v1267_v34  ;;  %878 = vmatprep.subr.bf16.mxu0 %v1272_v35 }
  0x43   :  { %919 = vmatprep.subr.bf16.mxu1 %v1275_v36 }
  0x45   :  { %879 = vmatpush1.bf16.msra.mxu0 %v1270_v37 }
  0x46   :  { %920 = vmatpush1.bf16.msra.mxu1 %v1273_v38  ;;  %880 = vmatprep.subr.bf16.mxu0 %v1278_v39 }
  0x47   :  { %921 = vmatprep.subr.bf16.mxu1 %v1281_v40 }
  0x49   :  { %881 = vmatpush1.bf16.msra.mxu0 %v1276_v41 }
  0x4a   :  { %922 = vmatpush1.bf16.msra.mxu1 %v1279_v42  ;;  %882 = vmatprep.subr.bf16.mxu0 %v1284_v43  ;;  %v1332_v43 = vld [vmem:[#allocation8 + $0xb0] ss:$12 sps:$4 sm:$0xff]  }
  0x4b   :  { %923 = vmatprep.subr.bf16.mxu1 %v1287_v44  ;;  %v1333_v44 = vld [vmem:[#allocation8 + $0x230] ss:$12 sps:$4 sm:$0xff]  }
  0x4d   :  { %883 = vmatpush2.bf16.msra.mxu0 %v1282_v45 }
  0x4e   :  { %924 = vmatpush2.bf16.msra.mxu1 %v1285_v46  ;;  %884 = vmatprep.subr.bf16.mxu0 %v1290_v47  ;;  %v1334_v46 = vld [vmem:[#allocation8 + $0x158] ss:$12 sps:$4 sm:$0xff]  }
  0x4f   :  { %925 = vmatprep.subr.bf16.mxu1 %v1293_v48  ;;  %v1335_v47 = vld [vmem:[#allocation8 + $0x2d8] ss:$12 sps:$4 sm:$0xff]  }
  0x50   :  { %v1336_v48 = vld [vmem:[#allocation8 + $0x98] ss:$12 sps:$4 sm:$0xff]  }
  0x51   :  { %885 = vmatpush2.bf16.msra.mxu0 %v1288_v49  ;;  %v1337_v49 = vld [vmem:[#allocation8 + $0x218] ss:$12 sps:$4 sm:$0xff]  }
  0x52   :  { %926 = vmatpush2.bf16.msra.mxu1 %v1291_v50  ;;  %886 = vmatprep.subr.bf16.mxu0 %v1296_v51  ;;  %v1338_v50 = vld [vmem:[#allocation8 + $0x140] ss:$12 sps:$4 sm:$0xff]  }
  0x53   :  { %927 = vmatprep.subr.bf16.mxu1 %v1299_v52  ;;  %v1339_v51 = vld [vmem:[#allocation8 + $0x2c0] ss:$12 sps:$4 sm:$0xff]  }
  0x54   :  { %v1340_v52 = vld [vmem:[#allocation8 + $0x80] ss:$12 sps:$4 sm:$0xff]  }
  0x55   :  { %887 = vmatpush2.bf16.msra.mxu0 %v1294_v53  ;;  %v1341_v53 = vld [vmem:[#allocation8 + $0x200] ss:$12 sps:$4 sm:$0xff]  }
  0x56   :  { %928 = vmatpush2.bf16.msra.mxu1 %v1297_v54  ;;  %888 = vmatprep.subr.bf16.mxu0 %v1302_v55  ;;  %v1342_v54 = vld [vmem:[#allocation8 + $0x128] ss:$12 sps:$4 sm:$0xff]  }
  0x57   :  { %929 = vmatprep.subr.bf16.mxu1 %v1305_v56  ;;  %v1343_v55 = vld [vmem:[#allocation8 + $0x2a8] ss:$12 sps:$4 sm:$0xff]  }
  0x58   :  { %v1344_v56 = vld [vmem:[#allocation8 + $0x68] ss:$12 sps:$4 sm:$0xff]  }
  0x59   :  { %889 = vmatpush2.bf16.msra.mxu0 %v1300_v57  ;;  %v1345_v57 = vld [vmem:[#allocation8 + $0x1e8] ss:$12 sps:$4 sm:$0xff]  }
  0x5a   :  { %930 = vmatpush2.bf16.msra.mxu1 %v1303_v58  ;;  %890 = vmatprep.subr.bf16.mxu0 %v1308_v59  ;;  %v1346_v58 = vld [vmem:[#allocation8 + $0x110] ss:$12 sps:$4 sm:$0xff]  }
  0x5b   :  { %931 = vmatprep.subr.bf16.mxu1 %v1311_v60  ;;  %v1347_v59 = vld [vmem:[#allocation8 + $0x290] ss:$12 sps:$4 sm:$0xff]  }
  0x5c   :  { %v1348_v60 = vld [vmem:[#allocation8 + $0x50] ss:$12 sps:$4 sm:$0xff]  }
  0x5d   :  { %891 = vmatpush2.bf16.msra.mxu0 %v1306_v61  ;;  %v1349_v61 = vld [vmem:[#allocation8 + $0x1d0] ss:$12 sps:$4 sm:$0xff]  }
  0x5e   :  { %932 = vmatpush2.bf16.msra.mxu1 %v1309_v62  ;;  %892 = vmatprep.subr.bf16.mxu0 %v1314_v63  ;;  %v1350_v62 = vld [vmem:[#allocation8 + $0xf8] ss:$12 sps:$4 sm:$0xff]  }
  0x5f   :  { %933 = vmatprep.subr.bf16.mxu1 %v1317_v0  ;;  %v1351_v63 = vld [vmem:[#allocation8 + $0x278] ss:$12 sps:$4 sm:$0xff]  }
  0x60   :  { %v1352_v0 = vld [vmem:[#allocation8 + $0x38] ss:$12 sps:$4 sm:$0xff]  }
  0x61   :  { %893 = vmatpush2.bf16.msra.mxu0 %v1312_v1  ;;  %v1353_v1 = vld [vmem:[#allocation8 + $0x1b8] ss:$12 sps:$4 sm:$0xff]  }
  0x62   :  { %934 = vmatpush2.bf16.msra.mxu1 %v1315_v2  ;;  %894 = vmatprep.subr.bf16.mxu0 %v1320_v3  ;;  %v1354_v2 = vld [vmem:[#allocation8 + $0xe0] ss:$12 sps:$4 sm:$0xff]  }
  0x63   :  { %935 = vmatprep.subr.bf16.mxu1 %v1323_v4  ;;  %v1355_v3 = vld [vmem:[#allocation8 + $0x260] ss:$12 sps:$4 sm:$0xff]  }
  0x64   :  { %v1356_v4 = vld [vmem:[#allocation8 + $0x20] ss:$12 sps:$4 sm:$0xff]  }
  0x65   :  { %895 = vmatpush2.bf16.msra.mxu0 %v1318_v5  ;;  %v1357_v5 = vld [vmem:[#allocation8 + $0x1a0] ss:$12 sps:$4 sm:$0xff]  }
  0x66   :  { %936 = vmatpush2.bf16.msra.mxu1 %v1321_v6  ;;  %896 = vmatprep.subr.bf16.mxu0 %v1326_v7  ;;  %v1358_v6 = vld [vmem:[#allocation8 + $0xc8] ss:$12 sps:$4 sm:$0xff]  }
  0x67   :  { %937 = vmatprep.subr.bf16.mxu1 %v1329_v8  ;;  %v1359_v7 = vld [vmem:[#allocation8 + $0x248] ss:$12 sps:$4 sm:$0xff]  }
  0x68   :  { %v1360_v8 = vld [vmem:[#allocation8 + $0x8] ss:$12 sps:$4 sm:$0xff]  }
  0x69   :  { %897 = vmatpush2.bf16.msra.mxu0 %v1324_v9  ;;  %v1361_v9 = vld [vmem:[#allocation8 + $0x188] ss:$12 sps:$4 sm:$0xff]  }
  0x6a   :  { %938 = vmatpush2.bf16.msra.mxu1 %v1327_v10  ;;  %1179 = vmatprep.subr.bf16.mxu0 %v1330_v11 }
  0x6b   :  { %1201 = vmatprep.subr.bf16.mxu1 %v1331_v12 }
  0xec   :  { %v153_v24 = vpop.f32.mrf.mxu0 }
  0xed   :  { %v194_v25 = vpop.f32.mrf.mxu1  ;;  %v154_v26 = vadd.f32 %v153_v24, %v75_v20 }
  0xee   :  { %v195_v27 = vadd.f32 %v194_v25, %v83_v21  ;;  %v155_v28 = vpop.f32.mrf.mxu0  ;;  %v337_v21 = vld [vmem:[%s1546_s4] sm:$0x7] }
  0xef   :  { %v196_v29 = vpop.f32.mrf.mxu1  ;;  %v156_v31 = vadd.f32 %v155_v28, %v79_v22  ;;  %v201_v33 = vmax.f32 %v154_v26, 0.0  ;;  %v346_v22 = vrot.slane %v337_v21, %v1511_v18 }
  0xf0   :  { %v203_v30 = vmax.f32 %v195_v27, 0.0  ;;  %v197_v32 = vadd.f32 %v196_v29, %v87_v23  ;;  %v157_v34 = vpop.f32.mrf.mxu0  ;;  %v342_v23 = vrot.slane %v337_v21, %v1504_v15 }
  0xf1   :  { %v198_v35 = vpop.f32.mrf.mxu1  ;;  %v202_v36 = vmax.f32 %v156_v31, 0.0  ;;  %v1518_v45 = vpack.c.bf16 %v201_v33, %v201_v33  ;;  %v1031_v31 = vld [vmem:[%s1547_s5] sm:$0x7] }
  0xf2   :  { %v204_v37 = vmax.f32 %v197_v32, 0.0  ;;  %v1516_v38 = vpack.c.bf16 %v203_v30, %v203_v30  ;;  %v158_v39 = vpop.f32.mrf.mxu0  ;;  %v350_v30 = vrot.slane %v337_v21, %v1506_v16  ;;  %v1040_v35 = vrot.slane %v1031_v31, %v1511_v18 }
  0xf3   :  { %v199_v40 = vpop.f32.mrf.mxu1  ;;  %v206_v41 = vpack.c.bf16 %v202_v36, %v202_v36  ;;  %v1056_v18 = vstv %s1548_s6 }
  0xf4   :  { %v208_v42 = vpack.c.bf16 %v204_v37, %v204_v37  ;;  %v1036_v40 = vrot.slane %v1031_v31, %v1504_v15 }
  0xf5   :  { %898 = vmatprep.mubr.bf16.mxu0 %v206_v41 }
  0xf6   :  { %939 = vmatprep.mubr.bf16.mxu1 %v208_v42  ;;  %899 = vmatmul.mubr.bf16.vlgmr.msra.gmra.mxu0 %v1518_v45 }
  0xf7   :  { %940 = vmatmul.mubr.bf16.vlgmr.msra.gmra.mxu1 %v1516_v38  ;;  %1180 = vmatpush3.bf16.msra.mxu0 %v1332_v43 }
  0xf8   :  { %1202 = vmatpush3.bf16.msra.mxu1 %v1333_v44  ;;  %980 = vmatprep.mubr.bf16.mxu0 %v206_v41 }
  0xf9   :  { %1020 = vmatprep.mubr.bf16.mxu1 %v208_v42  ;;  %1181 = vmatprep.subr.bf16.mxu0 %v1334_v46 }
  0xfa   :  { %1203 = vmatprep.subr.bf16.mxu1 %v1335_v47  ;;  %v1044_v47 = vrot.slane %v1031_v31, %v1506_v16 }
  0xfb   :  { %1182 = vmatpush3.bf16.msra.mxu0 %v1336_v48 }
  0xfc   :  { %1204 = vmatpush3.bf16.msra.mxu1 %v1337_v49  ;;  %1183 = vmatprep.subr.bf16.mxu0 %v1338_v50 }
  0xfd   :  { %1205 = vmatprep.subr.bf16.mxu1 %v1339_v51 }
  0xff   :  { %1184 = vmatpush3.bf16.msra.mxu0 %v1340_v52 }
 0x100   :  { %1206 = vmatpush3.bf16.msra.mxu1 %v1341_v53  ;;  %1185 = vmatprep.subr.bf16.mxu0 %v1342_v54 }
 0x101   :  { %1207 = vmatprep.subr.bf16.mxu1 %v1343_v55 }
 0x103   :  { %1186 = vmatpush3.bf16.msra.mxu0 %v1344_v56 }
 0x104   :  { %1208 = vmatpush3.bf16.msra.mxu1 %v1345_v57  ;;  %1187 = vmatprep.subr.bf16.mxu0 %v1346_v58 }
 0x105   :  { %1209 = vmatprep.subr.bf16.mxu1 %v1347_v59 }
 0x107   :  { %1188 = vmatpush3.bf16.msra.mxu0 %v1348_v60 }
 0x108   :  { %1210 = vmatpush3.bf16.msra.mxu1 %v1349_v61  ;;  %1189 = vmatprep.subr.bf16.mxu0 %v1350_v62 }
 0x109   :  { %1211 = vmatprep.subr.bf16.mxu1 %v1351_v63 }
 0x10b   :  { %1190 = vmatpush3.bf16.msra.mxu0 %v1352_v0 }
 0x10c   :  { %1212 = vmatpush3.bf16.msra.mxu1 %v1353_v1  ;;  %1191 = vmatprep.subr.bf16.mxu0 %v1354_v2 }
 0x10d   :  { %1213 = vmatprep.subr.bf16.mxu1 %v1355_v3 }
 0x10f   :  { %1192 = vmatpush3.bf16.msra.mxu0 %v1356_v4 }
 0x110   :  { %1214 = vmatpush3.bf16.msra.mxu1 %v1357_v5  ;;  %1193 = vmatprep.subr.bf16.mxu0 %v1358_v6 }
 0x111   :  { %1215 = vmatprep.subr.bf16.mxu1 %v1359_v7 }
 0x113   :  { %1194 = vmatpush3.bf16.msra.mxu0 %v1360_v8 }
 0x114   :  { %1216 = vmatpush3.bf16.msra.mxu1 %v1361_v9 }
 0x116   :  { %981 = vmatmul.mubr.bf16.vlgmr.msra.gmra.mxu0 %v1518_v45 }
 0x117   :  { %1021 = vmatmul.mubr.bf16.vlgmr.msra.gmra.mxu1 %v1516_v38 }
 0x1b6   :  { %v900_v10 = vpop.f32.mrf.mxu0 }
 0x1b7   :  { %v941_v11 = vpop.f32.mrf.mxu1  ;;  %v901_v25 = vadd.f32 %v900_v10, %v342_v23 }
 0x1b8   :  { %v902_v12 = vpop.f32.mrf.mxu0 }
 0x1b9   :  { %v943_v13 = vpop.f32.mrf.mxu1  ;;  %v903_v24 = vadd.f32 %v902_v12, %v346_v22  ;;  %v942_v29 = vadd.f32 %v941_v11, %v901_v25 }
 0x1ba   :  { %v904_v14 = vpop.f32.mrf.mxu0 }
 0x1bb   :  { %v945_v17 = vpop.f32.mrf.mxu1  ;;  %v944_v26 = vadd.f32 %v943_v13, %v903_v24  ;;  %v1028_v39 = vmax.f32 %v942_v29, 0.0 }
 0x1bc   :  { %v905_v19 = vpop.f32.mrf.mxu0 }
 0x1bd   :  { %v946_v20 = vpop.f32.mrf.mxu1  ;;  %v1029_v34 = vmax.f32 %v944_v26, 0.0  ;;  %v1048_v48 = vmul.f32 %v1036_v40, %v1028_v39 }
 0x1bf   :  { %v1049_v45 = vmul.f32 %v1040_v35, %v1029_v34 }
 0x1c1   :  { %v1051_v51 = vadd.f32 %v1049_v45, %v1048_v48 }
 0x1d6   :  { %v1195_v27 = vpop.f32.mrf.mxu0 }
 0x1d7   :  { %v1217_v28 = vpop.f32.mrf.mxu1 }
 0x1d8   :  { %v1196_v32 = vpop.f32.mrf.mxu0 }
 0x1d9   :  { %v1218_v33 = vpop.f32.mrf.mxu1  ;;  %v1197_v36 = vadd.f32 %v1196_v32, %v1195_v27 }
 0x1da   :  { %v1198_v37 = vpop.f32.mrf.mxu0  ;;  %v1219_v42 = vadd.f32 %v1218_v33, %v1217_v28 }
 0x1db   :  { %v1220_v38 = vpop.f32.mrf.mxu1  ;;  %v983_v41 = vadd.f32 %v1197_v36, %v350_v30 }
 0x1dc   :  { %v1199_v43 = vpop.f32.mrf.mxu0 }
 0x1dd   :  { %v1221_v44 = vpop.f32.mrf.mxu1  ;;  %v1023_v46 = vadd.f32 %v1219_v42, %v983_v41 }
 0x1df   :  { %v1030_v49 = vmax.f32 %v1023_v46, 0.0 }
 0x1e1   :  { %v1050_v50 = vmul.f32 %v1044_v47, %v1030_v49 }
 0x1e3   :  { %v1052_v52 = vadd.f32 %v1051_v51, %v1050_v50 }
 0x1e5   :  { %1053 = vadd.xlane.f32.xlu0 %v1052_v52 }
 0x26e   :  { %v1054_v15 = vpop.xlane.xlu0 %1053 }
 0x26f   :  { %v1057_v53 = vadd.f32 %v1056_v18, %v1054_v15 }
 0x271   :  { %1058 = vst [vmem:[#allocation9] sm:$0xff] %v1057_v53 }
 0x272   :  { %1433 = shalt.err (!%p1430_p5)
}
 0x273   :  { %1068 = dma.vmem_to_hbm [thread:$0]  %s1066_s21, 128, %s1549_s7, [#allocation5]  }
 0x274   :  { %1446 = dma.done.wait [#allocation5], 128  }
 0x275   :  { %1447 = vsyncadd [#allocation5], 4294967168 }
 0x276   :  { %1072 = vsyncpa [#allocation4], 1 }
 0x277   :  { %1073 = vsyncpa [#allocation7], 1 }
 0x278   :  { %1074 = vsyncpa [#allocation5], 1 }

</bundles_post_ra>
